<compile_context>
chip_gen: v6e
topology: v6e:2x2x1
jax: 0.10.0
libtpu: 0.0.40
codegen_flags: <defaults>
</compile_context>

<pallas_src>
import jax
import jax.numpy as jnp
from jax.experimental import pallas as pl
from jax.experimental.pallas import tpu as pltpu


def _round_up(x, m):
    return ((x + m - 1) // m) * m


def _choose_tile(total, cap, granule=128):
    """Largest tile <= cap (multiple of granule) minimizing padding of `total`."""
    if total <= cap:
        return total
    best, best_pad = granule, None
    t = granule
    while t <= cap:
        pad = _round_up(total, t) - total
        if best_pad is None or pad < best_pad or (pad == best_pad and t > best):
            best, best_pad = t, pad
        t += granule
    return best


def _tpu_generation_defaults():
    """(vmem_budget_bytes, tm_cap, prefer_two_m_tiles) per TPU generation."""
    kind = ""
    try:
        kind = jax.devices()[0].device_kind.lower()
    except Exception:
        pass
    if "v7" in kind:                       # 64 MiB VMEM, 2 TensorCores
        return 40 * 2**20, 512, True
    if "v6" in kind:                       # 128 MiB VMEM -> big tiles pay off
        return 96 * 2**20, 1024, False
    if "v5" in kind:                       # 128 MiB VMEM, single vst slot
        return 64 * 2**20, 512, False
    return 32 * 2**20, 512, False


def _linear_kernel_fused(x_ref, w_ref, b_ref, o_ref):
    # Whole-K block: no accumulator round-trip at all. Bias add + cast fused
    # into the single output store.
    o_ref[...] = (
        jnp.dot(x_ref[...], w_ref[...], preferred_element_type=jnp.float32)
        + b_ref[...]
    ).astype(o_ref.dtype)


def _linear_kernel_acc(x_ref, w_ref, b_ref, o_ref, acc_ref):
    # K-tiled reduction (k is the last grid axis). First step initializes the
    # accumulator with the partial product (no zero-init pass), middle steps
    # accumulate, last step fuses final partial + bias + cast directly into
    # the output store (acc is never written on the last step).
    k = pl.program_id(2)
    nk = pl.num_programs(2)
    partial = jnp.dot(x_ref[...], w_ref[...], preferred_element_type=jnp.float32)

    @pl.when(k == 0)
    def _():
        acc_ref[...] = partial

    @pl.when(jnp.logical_and(k > 0, k < nk - 1))
    def _():
        acc_ref[...] += partial

    @pl.when(k == nk - 1)
    def _():
        o_ref[...] = (acc_ref[...] + partial + b_ref[...]).astype(o_ref.dtype)


def time_distributed_linear(x, w, b, *, use_bf16_inputs=False,
                            vmem_budget_bytes=None):
    """Apply Linear(w, b) to every time step of x: (B, T, F_in) -> (B, T, F_out).

    use_bf16_inputs=True feeds the MXU bf16 operands (halves x/w HBM bytes,
    runs the MXU at its native bf16 peak) while accumulating in f32; it is the
    recommended setting for production shapes (expect ~bf16-level numerics).
    """
    B, T, F_in = x.shape
    F_in_w, F_out = w.shape
    assert F_in_w == F_in, "weight / input feature mismatch"
    M = B * T
    out_dtype = x.dtype

    budget, tm_cap, prefer_two_m_tiles = _tpu_generation_defaults()
    if vmem_budget_bytes is not None:
        budget = vmem_budget_bytes

    in_dtype = jnp.bfloat16 if use_bf16_inputs else x.dtype
    in_bytes = jnp.dtype(in_dtype).itemsize
    out_bytes = jnp.dtype(out_dtype).itemsize

    # --- Lane-dense padded extents (zeros, sliced off afterwards) ------------
    F_in_p = _round_up(F_in, 128)
    F_out_p = _round_up(F_out, 128)

    # --- Tile plan ------------------------------------------------------------
    # Start from the "everything resident" plan (whole K, whole N per block,
    # tm minimizing M padding). If the double-buffered working set exceeds the
    # budget, shrink tm first (cheapest in HBM traffic), then tk (adds acc
    # passes + weight re-streaming), then tn (re-streams x); error if even the
    # minimum plan does not fit.
    M8 = _round_up(M, 8)
    tm = M8 if M8 <= tm_cap else _choose_tile(M8, tm_cap, granule=128)
    tk = F_in_p
    tn = F_out_p

    def _vmem_bytes(tm_, tk_, tn_):
        multi_k = tk_ < F_in_p
        return (2 * tm_ * tk_ * in_bytes          # x tile, double-buffered
                + 2 * tk_ * tn_ * in_bytes        # w tile, double-buffered
                + 2 * tn_ * 4                     # bias row
                + 2 * tm_ * tn_ * out_bytes       # out tile, double-buffered
                + (tm_ * tn_ * 4 if multi_k else 0))  # f32 accumulator

    tm_floor = min(tm, 128)
    while _vmem_bytes(tm, tk, tn) > budget:
        if tm > tm_floor:
            tm = max(tm_floor, _round_up(tm // 2, 8))
        elif tk > 128:
            tk = _choose_tile(F_in_p, max(128, tk // 2))
        elif tn > 128:
            tn = _choose_tile(F_out_p, max(128, tn // 2))
        else:
            raise ValueError(
                f"TimeDistributed linear: tile plan does not fit the VMEM "
                f"budget ({budget} bytes) even at minimum tile sizes.")

    # v7x megacore: make sure the "parallel" M axis has >= 2 tiles so both
    # TensorCores get work (harmless elsewhere; only shrinks tm).
    if prefer_two_m_tiles and _round_up(M, tm) // tm < 2 and tm >= 16:
        tm = max(8, _round_up(tm // 2, 8))

    M_p = _round_up(M, tm)
    F_in_T = _round_up(F_in_p, tk)
    F_out_T = _round_up(F_out_p, tn)
    m_tiles, n_tiles, k_tiles = M_p // tm, F_out_T // tn, F_in_T // tk

    # --- Flatten, cast (before padding), zero-pad with jnp.pad ---------------
    x_flat = x.reshape(M, F_in).astype(in_dtype)   # x.contiguous().view(-1, F_in)
    w_in = w.astype(in_dtype)
    b_row = b.astype(jnp.float32).reshape(1, F_out)

    def _pad2(a, rows, cols):
        pr, pc = rows - a.shape[0], cols - a.shape[1]
        if pr == 0 and pc == 0:
            return a                               # skip the copy entirely
        return jnp.pad(a, ((0, pr), (0, pc)))

    x_pad = _pad2(x_flat, M_p, F_in_T)
    w_pad = _pad2(w_in, F_in_T, F_out_T)
    b_pad = _pad2(b_row, 1, F_out_T)

    cost = pl.CostEstimate(
        flops=2 * M_p * F_in_T * F_out_T,
        transcendentals=0,
        bytes_accessed=(x_pad.size * in_bytes + w_pad.size * in_bytes
                        + b_pad.size * 4 + M_p * F_out_T * out_bytes),
    )

    if k_tiles == 1:
        kernel = _linear_kernel_fused
        grid = (m_tiles, n_tiles)
        in_specs = [
            pl.BlockSpec((tm, tk), lambda i, j: (i, 0)),       # x rows
            pl.BlockSpec((tk, tn), lambda i, j: (0, j)),       # weight (resident)
            pl.BlockSpec((1, tn), lambda i, j: (0, j)),        # bias
        ]
        out_spec = pl.BlockSpec((tm, tn), lambda i, j: (i, j))
        scratch = []
        dims = ("parallel", "parallel")
    else:
        kernel = _linear_kernel_acc
        grid = (m_tiles, n_tiles, k_tiles)                     # reduction last
        in_specs = [
            pl.BlockSpec((tm, tk), lambda i, j, k: (i, k)),    # x rows
            pl.BlockSpec((tk, tn), lambda i, j, k: (k, j)),    # weight
            pl.BlockSpec((1, tn), lambda i, j, k: (0, j)),     # bias
        ]
        out_spec = pl.BlockSpec((tm, tn), lambda i, j, k: (i, j))
        scratch = [pltpu.VMEM((tm, tn), jnp.float32)]
        dims = ("parallel", "parallel", "arbitrary")

    y_pad = pl.pallas_call(
        kernel,
        out_shape=jax.ShapeDtypeStruct((M_p, F_out_T), out_dtype),
        grid_spec=pltpu.PrefetchScalarGridSpec(
            num_scalar_prefetch=0,
            grid=grid,
            in_specs=in_specs,
            out_specs=out_spec,
            scratch_shapes=scratch,
        ),
        compiler_params=pltpu.CompilerParams(
            dimension_semantics=dims,
            vmem_limit_bytes=int(budget * 1.25),   # plan + ~25% headroom
        ),
        cost_estimate=cost,
    )(x_pad, w_pad, b_pad)

    # y.contiguous().view(x.size(0), -1, y.size(-1)), dropping any padding.
    if M_p != M or F_out_T != F_out:
        y_pad = y_pad[:M, :F_out]
    return y_pad.reshape(B, T, F_out)


if __name__ == "__main__":
    # Small deterministic shapes: batch=2, seq=8, in_features=32, out_features=32
    B, T, F_in, F_out = 2, 8, 32, 32

    key = jax.random.PRNGKey(0)
    kx, kw, kb = jax.random.split(key, 3)

    x = jax.random.normal(kx, (B, T, F_in), dtype=jnp.float32)
    # Deterministic synthetic parameters for the wrapped nn.Linear(F_in, F_out)
    w = jax.random.normal(kw, (F_in, F_out), dtype=jnp.float32) * 0.1
    b = jax.random.normal(kb, (F_out,), dtype=jnp.float32) * 0.1

    y = time_distributed_linear(x, w, b)
    y = jax.block_until_ready(y)

    # Sanity check vs plain-JAX reference of the same semantics
    y_ref = (x.reshape(-1, F_in) @ w + b).reshape(B, -1, F_out)
    assert y.shape == (B, T, F_out)
    assert jnp.allclose(y, y_ref, atol=1e-5, rtol=1e-5)

    print("KERNEL_OK")
</pallas_src>

<mosaic_0001>
module attributes {stable_mosaic.version = 11 : i64} {
  func.func @_linear_kernel_fused(%arg0: i32, %arg1: i32, %arg2: memref<16x128xf32, #tpu.memory_space<vmem>>, %arg3: memref<128x128xf32, #tpu.memory_space<vmem>>, %arg4: memref<1x128xf32, #tpu.memory_space<vmem>>, %arg5: memref<16x128xf32, #tpu.memory_space<vmem>>) attributes {dimension_semantics = [#tpu.dimension_semantics<parallel>, #tpu.dimension_semantics<parallel>], iteration_bounds = array<i64: 1, 1>, scalar_prefetch = 0 : i64, scratch_operands = 0 : i64, tpu.core_type = #tpu.core_type<tc>, window_params = [{transform_indices = @transform_0, window_bounds = array<i64: 16, 128>}, {transform_indices = @transform_1, window_bounds = array<i64: 128, 128>}, {transform_indices = @transform_2, window_bounds = array<i64: 1, 128>}, {transform_indices = @transform_3, window_bounds = array<i64: 16, 128>}]} {
    %c0 = arith.constant 0 : index
    %c0_0 = arith.constant 0 : index
    %0 = vector.load %arg2[%c0, %c0_0] : memref<16x128xf32, #tpu.memory_space<vmem>>, vector<16x128xf32>
    %c0_1 = arith.constant 0 : index
    %c0_2 = arith.constant 0 : index
    %1 = vector.load %arg3[%c0_1, %c0_2] : memref<128x128xf32, #tpu.memory_space<vmem>>, vector<128x128xf32>
    %cst = arith.constant dense<0.000000e+00> : vector<16x128xf32>
    %2 = tpu.matmul %0, %1, %cst {dimension_numbers = #tpu.dot_dimension_numbers<[1], [0], [0], [1], [0, 0, 1, 1], [], []>} : vector<16x128xf32>, vector<128x128xf32>, vector<16x128xf32> -> vector<16x128xf32>
    %c0_3 = arith.constant 0 : index
    %c0_4 = arith.constant 0 : index
    %3 = vector.load %arg4[%c0_3, %c0_4] : memref<1x128xf32, #tpu.memory_space<vmem>>, vector<1x128xf32>
    %4 = vector.broadcast %3 : vector<1x128xf32> to vector<16x128xf32>
    %5 = arith.addf %2, %4 : vector<16x128xf32>
    %c0_5 = arith.constant 0 : index
    %c0_6 = arith.constant 0 : index
    %6 = vector.load %arg5[%c0_5, %c0_6] : memref<16x128xf32, #tpu.memory_space<vmem>>, vector<16x128xf32>
    tpu.vector_store %arg5[%c0_5, %c0_6], %5 {strides = array<i32>} : memref<16x128xf32, #tpu.memory_space<vmem>>, vector<16x128xf32>,
    return
  }
  func.func @transform_0(%arg0: i32, %arg1: i32) -> (i32, i32) {
    %c0_i32 = arith.constant 0 : i32
    %c0_i32_0 = arith.constant 0 : i32
    return %arg0, %c0_i32 : i32, i32
  }
  func.func @transform_1(%arg0: i32, %arg1: i32) -> (i32, i32) {
    %c0_i32 = arith.constant 0 : i32
    %c0_i32_0 = arith.constant 0 : i32
    return %c0_i32, %arg1 : i32, i32
  }
  func.func @transform_2(%arg0: i32, %arg1: i32) -> (i32, i32) {
    %c0_i32 = arith.constant 0 : i32
    %c0_i32_0 = arith.constant 0 : i32
    return %c0_i32, %arg1 : i32, i32
  }
  func.func @transform_3(%arg0: i32, %arg1: i32) -> (i32, i32) {
    %c0_i32 = arith.constant 0 : i32
    return %arg0, %arg1 : i32, i32
  }
}

</mosaic_0001>

<bundles_post_ra>
// kernel: tpu_custom_call.1
= control target key start
LH: loop header
LB: loop body
LE: loop exit
PB: predicated region body
PF: predicated region fallthrough
CT: control target
= control target key end

     0   :  { %8 = vsyncpa [#allocation3], 0  ;;  %s334_s0 = inlined_call_operand.hbm [shape: f32[16,128], index: 0, kind: input, shape index: {}]   ;;  %s335_s1 = inlined_call_operand.hbm [shape: f32[128,128], index: 1, kind: input, shape index: {}]   ;;  %s336_s2 = inlined_call_operand.vmem [shape: f32[1,128], index: 2, kind: input, shape index: {}]   ;;  %s337_s3 = inlined_call_operand.hbm [shape: f32[16,128], index: 3, kind: output, shape index: {}]  }
   0x1   :  { %9 = vsyncpa [#allocation6], 0 }
   0x2   :  { %10 = vsyncpa [#allocation4], 0  ;;  %s288_s12 = smov [#allocation2]  }
   0x3   :  { %s16_s13 = sshll.u32 %s288_s12, 4  ;;  %s17_s13 = int_to_ptr.vmem [resolvable:$true] %s16_s13 }
   0x4   :  { %s230_s14 = scalar_lea.vmem %s17_s13, 256  ;;  %p235_p1 = scmp.lt.s32.totalorder %s17_s13, %s17_s13 }
   0x5   :  { %p231_p0 = scmp.ne.s32.totalorder %s17_s13, %s230_s14  ;;  %p236_p2 = scmp.lt.s32.totalorder %s230_s14, %s230_s14 }
   0x7   :  { %p237_p3 = por %p236_p2, %p235_p1 }
   0x9   :  { %p238_p4 = pnand %p237_p3, %p231_p0 }
   0xb   :  { %241 = shalt.err (!%p238_p4)
}
   0xc   :  { %s289_s15 = smov 128   ;;  %s290_s16 = smov 8  }
   0xd   :  { %22 = dma.hbm_to_vmem [thread:$0]  %s334_s0, 256, %s17_s13, [#allocation3], %s289_s15, %s289_s15, %s290_s16  }
   0xe   :  { %s291_s19 = smov [#allocation5]  }
   0xf   :  { %s28_s20 = sshll.u32 %s291_s19, 4  ;;  %s29_s20 = int_to_ptr.vmem [resolvable:$true] %s28_s20 }
  0x10   :  { %s250_s21 = scalar_lea.vmem %s29_s20, 2048  ;;  %p255_p6 = scmp.lt.s32.totalorder %s29_s20, %s29_s20 }
  0x11   :  { %p251_p5 = scmp.ne.s32.totalorder %s29_s20, %s250_s21  ;;  %p256_p7 = scmp.lt.s32.totalorder %s250_s21, %s250_s21 }
  0x13   :  { %p257_p8 = por %p256_p7, %p255_p6 }
  0x15   :  { %p258_p9 = pnand %p257_p8, %p251_p5 }
  0x17   :  { %261 = shalt.err (!%p258_p9)
}
  0x18   :  { %34 = dma.hbm_to_vmem [thread:$0]  %s335_s1, 2048, %s29_s20, [#allocation6], %s289_s15, %s289_s15, %s290_s16  }
  0x19   :  { %282 = dma.done.wait [#allocation3], 256  }
  0x1a   :  { %283 = vsyncadd [#allocation3], 4294967040 }
  0x1b   :  { %284 = dma.done.wait [#allocation6], 2048  }
  0x1c   :  { %285 = vsyncadd [#allocation6], 4294965248  ;;  %v60_v0 = vld [vmem:[#allocation5 + $0x78] sm:$0xff]  ;;  %v59_v1 = vld [vmem:[#allocation5 + $0x70] sm:$0xff]  ;;  %s292_s24 = smov [#allocation7]  }
  0x1d   :  { %182 = vmatprep.subr.mxu0 %v60_v0  ;;  %v58_v2 = vld [vmem:[#allocation5 + $0x68] sm:$0xff]  ;;  %v57_v3 = vld [vmem:[#allocation5 + $0x60] sm:$0xff]  ;;  %v43_v4 = vld [vmem:[#allocation2] sm:$0xff]  ;;  %s150_s25 = sshll.u32 %s292_s24, 4  ;;  %s151_s25 = int_to_ptr.vmem [resolvable:$true] %s150_s25 }
  0x1e   :  { %183 = vmatpush3.msra.mxu0 %v60_v0  ;;  %v56_v5 = vld [vmem:[#allocation5 + $0x58] sm:$0xff]  ;;  %214 = vmatprep.mubr.f32.mxu0 %v43_v4  ;;  %v55_v6 = vld [vmem:[#allocation5 + $0x50] sm:$0xff]  ;;  %v54_v7 = vld [vmem:[#allocation5 + $0x48] sm:$0xff]  ;;  %s262_s26 = scalar_lea.vmem %s151_s25, 256  ;;  %p267_p11 = scmp.lt.s32.totalorder %s151_s25, %s151_s25 }
  0x1f   :  { %184 = vmatprep.subr.mxu0 %v59_v1  ;;  %v53_v8 = vld [vmem:[#allocation5 + $0x40] sm:$0xff]  ;;  %v52_v9 = vld [vmem:[#allocation5 + $0x38] sm:$0xff]  ;;  %v51_v10 = vld [vmem:[#allocation5 + $0x30] sm:$0xff]  ;;  %p263_p10 = scmp.ne.s32.totalorder %s151_s25, %s262_s26  ;;  %p268_p12 = scmp.lt.s32.totalorder %s262_s26, %s262_s26 }
  0x20   :  { %185 = vmatpush3.msra.mxu0 %v59_v1  ;;  %v50_v11 = vld [vmem:[#allocation5 + $0x28] sm:$0xff]  ;;  %v49_v12 = vld [vmem:[#allocation5 + $0x20] sm:$0xff]  ;;  %v48_v13 = vld [vmem:[#allocation5 + $0x18] sm:$0xff] }
  0x21   :  { %186 = vmatprep.subr.mxu0 %v58_v2  ;;  %v47_v14 = vld [vmem:[#allocation5 + $0x10] sm:$0xff]  ;;  %v46_v15 = vld [vmem:[#allocation5 + $0x8] sm:$0xff]  ;;  %v45_v16 = vld [vmem:[#allocation5] sm:$0xff]  ;;  %p269_p13 = por %p268_p12, %p267_p11 }
  0x22   :  { %187 = vmatpush3.msra.mxu0 %v58_v2  ;;  %v44_v17 = vld [vmem:[#allocation2 + $0x8] sm:$0xff]  ;;  %v163_v18 = vld [vmem:[%s336_s2] ss:$0 sm:$0xff] }
  0x23   :  { %188 = vmatprep.subr.mxu0 %v57_v3  ;;  %p270_p0 = pnand %p269_p13, %p263_p10 }
  0x24   :  { %189 = vmatpush3.msra.mxu0 %v57_v3 }
  0x25   :  { %190 = vmatprep.subr.mxu0 %v56_v5 }
  0x26   :  { %191 = vmatpush3.msra.mxu0 %v56_v5 }
  0x27   :  { %192 = vmatprep.subr.mxu0 %v55_v6 }
  0x28   :  { %193 = vmatpush3.msra.mxu0 %v55_v6 }
  0x29   :  { %194 = vmatprep.subr.mxu0 %v54_v7 }
  0x2a   :  { %195 = vmatpush3.msra.mxu0 %v54_v7 }
  0x2b   :  { %196 = vmatprep.subr.mxu0 %v53_v8 }
  0x2c   :  { %197 = vmatpush3.msra.mxu0 %v53_v8 }
  0x2d   :  { %198 = vmatprep.subr.mxu0 %v52_v9 }
  0x2e   :  { %199 = vmatpush3.msra.mxu0 %v52_v9 }
  0x2f   :  { %200 = vmatprep.subr.mxu0 %v51_v10 }
  0x30   :  { %201 = vmatpush3.msra.mxu0 %v51_v10 }
  0x31   :  { %202 = vmatprep.subr.mxu0 %v50_v11 }
  0x32   :  { %203 = vmatpush3.msra.mxu0 %v50_v11 }
  0x33   :  { %204 = vmatprep.subr.mxu0 %v49_v12 }
  0x34   :  { %205 = vmatpush3.msra.mxu0 %v49_v12 }
  0x35   :  { %206 = vmatprep.subr.mxu0 %v48_v13 }
  0x36   :  { %207 = vmatpush3.msra.mxu0 %v48_v13 }
  0x37   :  { %208 = vmatprep.subr.mxu0 %v47_v14 }
  0x38   :  { %209 = vmatpush3.msra.mxu0 %v47_v14 }
  0x39   :  { %210 = vmatprep.subr.mxu0 %v46_v15 }
  0x3a   :  { %211 = vmatpush3.msra.mxu0 %v46_v15 }
  0x3b   :  { %212 = vmatprep.subr.mxu0 %v45_v16 }
  0x3c   :  { %213 = vmatpush3.msra.mxu0 %v45_v16 }
  0x3d   :  { %215 = vmatmul.mubr.f32.vlgmr.msra.gmra.mxu0 %v44_v17 }
  0xfd   :  { %v216_v19 = vpop.f32.mrf.mxu0 }
  0xfe   :  { %v140_v20 = vadd.f32 %v216_v19, %v163_v18 }
  0xff   :  { %v134_v21 = vpop.f32.mrf.mxu0 }
 0x100   :  { %144 = vst [vmem:[#allocation7 + $0x8] sm:$0xff] %v140_v20  ;;  %v135_v22 = vadd.f32 %v163_v18, %v134_v21 }
 0x102   :  { %143 = vst [vmem:[#allocation7] sm:$0xff] %v135_v22 }
 0x103   :  { %273 = shalt.err (!%p270_p0)
}
 0x104   :  { %156 = dma.vmem_to_hbm [thread:$0]  %s151_s25, 256, %s337_s3, [#allocation4], %s289_s15, %s289_s15, %s290_s16  }
 0x105   :  { %286 = dma.done.wait [#allocation4], 256  }
 0x106   :  { %287 = vsyncadd [#allocation4], 4294967040 }
 0x107   :  { %160 = vsyncpa [#allocation3], 1 }
 0x108   :  { %161 = vsyncpa [#allocation6], 1 }
 0x109   :  { %162 = vsyncpa [#allocation4], 1 }

</bundles_post_ra>
